<compile_context>
chip_gen: v6e
topology: v6e:2x2x1
jax: 0.10.0
libtpu: 0.0.40
codegen_flags: <defaults>
</compile_context>

<pallas_src>
import functools

import jax
import jax.numpy as jnp
from jax.experimental import pallas as pl
from jax.experimental.pallas import tpu as pltpu


def _round_up(x, m):
    return (x + m - 1) // m * m


# -----------------------------------------------------------------------------
# Kernel
# -----------------------------------------------------------------------------
def _dynamics_kernel(
    slots_ref,    # (tm, slot_dim)    original dtype (f32)
    protos_ref,   # (tm, action_dim)
    vars_ref,     # (tm, action_dim)
    w_tok_ref,    # (slot_dim, embed)     compute dtype
    w_act_ref,    # (action_dim, embed)   compute dtype
    w_var_ref,    # (action_dim, embed)   compute dtype
    b_in_ref,     # (1, embed)            f32, = b_tok + b_act + b_var
    w_head_ref,   # (embed, slot_dim)     compute dtype, LN-gamma folded in
    b_head_ref,   # (1, slot_dim)         f32, LN-beta folded in
    o_ref,        # (tm, slot_dim)
    *,
    eps: float,
    residual: bool,
    compute_dtype,
):
    cd = compute_dtype
    slots = slots_ref[...]

    # Fused input projection: tok_emb(slots) + action_emb(protos) + variability_emb(vars)
    # as three accumulated MXU dots (f32 accumulation).
    cond = jnp.dot(slots.astype(cd), w_tok_ref[...],
                   preferred_element_type=jnp.float32)
    cond = cond + jnp.dot(protos_ref[...].astype(cd), w_act_ref[...],
                          preferred_element_type=jnp.float32)
    cond = cond + jnp.dot(vars_ref[...].astype(cd), w_var_ref[...],
                          preferred_element_type=jnp.float32)
    cond = cond + b_in_ref[...]

    # LayerNorm over embed_dim in f32 (rsqrt on the EUP slot).  The affine (gamma, beta)
    # is folded into w_head / b_head in the wrapper.
    mean = jnp.mean(cond, axis=-1, keepdims=True)
    centered = cond - mean
    variance = jnp.mean(centered * centered, axis=-1, keepdims=True)
    normed = centered * jax.lax.rsqrt(variance + eps)

    # Regression-head Linear at natural output width.
    out = jnp.dot(normed.astype(cd), w_head_ref[...],
                  preferred_element_type=jnp.float32) + b_head_ref[...]

    if residual:
        out = out + slots.astype(jnp.float32)   # f32 residual straight from the slots ref

    o_ref[...] = out.astype(o_ref.dtype)


# -----------------------------------------------------------------------------
# Wrapper
# -----------------------------------------------------------------------------
def slot_dynamics_forward(slots, action_protos, action_vars, params, *,
                          residual=True, eps=1e-5, tile_rows=None,
                          compute_dtype=jnp.bfloat16):
    """Fused forward pass of BaseSlotDynamicsModel (sum-conditioning + variability).

    slots:         (B, N, slot_dim)
    action_protos: (B, N, action_dim)
    action_vars:   (B, N, action_dim)
    returns:       (B, N, slot_dim)
    """
    B, N, slot_dim = slots.shape
    action_dim = action_protos.shape[-1]
    embed_dim = params["w_tok"].shape[1]
    M = B * N
    in_dim = slot_dim + 2 * action_dim
    out_dtype = slots.dtype
    in_itemsize = jnp.dtype(out_dtype).itemsize
    cd_bytes = jnp.dtype(compute_dtype).itemsize

    # ---- inputs: just flatten (free); no concat / pad / cast pre-pass ----
    s2 = slots.reshape(M, slot_dim)
    p2 = action_protos.reshape(M, action_dim)
    v2 = action_vars.reshape(M, action_dim)

    # ---- parameters: fold LN affine into the head, pre-sum the input biases (one-time) ----
    w_tok = params["w_tok"].astype(compute_dtype)
    w_act = params["w_act"].astype(compute_dtype)
    w_var = params["w_var"].astype(compute_dtype)
    b_in = (params["b_tok"] + params["b_act"] + params["b_var"]).astype(jnp.float32)

    gamma = params["ln_gamma"].astype(jnp.float32).reshape(-1)       # (embed,)
    beta = params["ln_beta"].astype(jnp.float32).reshape(1, -1)      # (1, embed)
    w_head_f32 = params["w_head"].astype(jnp.float32)
    w_head = (gamma[:, None] * w_head_f32).astype(compute_dtype)     # (embed, slot_dim)
    b_head = (beta @ w_head_f32 + params["b_head"].astype(jnp.float32))  # (1, slot_dim)

    # ---- row tiling: big tiles to amortize per-step overhead, but >=4 grid steps
    #      when M allows it (pipelining + both v7x TensorCores) ----
    row_align = 8
    if tile_rows is None:
        tm = min(4096, _round_up(max(pl.cdiv(M, 4), 1), row_align))
    else:
        tm = _round_up(int(tile_rows), row_align)
    tm = max(tm, row_align)
    grid = pl.cdiv(M, tm)   # ragged edge handled by Pallas masked edge blocks (no padding)

    # ---- explicit VMEM budget (v5e scoped default is only 16 MiB; v7x physical 64 MiB) ----
    weight_bytes = ((in_dim * embed_dim + embed_dim * slot_dim) * cd_bytes
                    + (embed_dim + slot_dim) * 4)
    est_vmem = (2 * tm * in_dim * in_itemsize            # double-buffered input tiles
                + 2 * tm * slot_dim * in_itemsize        # double-buffered output tiles
                + 2 * weight_bytes                       # grid-invariant params
                + 6 * tm * embed_dim * 4)                # f32/bf16 intermediates headroom
    vmem_limit = int(min(max(est_vmem * 3 // 2, 16 * 2**20), 64 * 2**20))

    cost = pl.CostEstimate(
        flops=2 * M * (in_dim * embed_dim + embed_dim * slot_dim),
        transcendentals=M,
        bytes_accessed=(M * in_dim * in_itemsize
                        + M * slot_dim * in_itemsize
                        + weight_bytes),
    )

    kernel = functools.partial(_dynamics_kernel, eps=eps, residual=residual,
                               compute_dtype=compute_dtype)

    # Grid-invariant params: constant index_map -> Pallas does not re-DMA them per step.
    const = lambda shape: pl.BlockSpec(shape, lambda i: (0, 0))

    out2 = pl.pallas_call(
        kernel,
        out_shape=jax.ShapeDtypeStruct((M, slot_dim), out_dtype),
        grid_spec=pltpu.PrefetchScalarGridSpec(
            num_scalar_prefetch=0,
            grid=(grid,),
            in_specs=[
                pl.BlockSpec((tm, slot_dim), lambda i: (i, 0)),    # slots
                pl.BlockSpec((tm, action_dim), lambda i: (i, 0)),  # action prototypes
                pl.BlockSpec((tm, action_dim), lambda i: (i, 0)),  # action variabilities
                const((slot_dim, embed_dim)),                      # w_tok
                const((action_dim, embed_dim)),                    # w_act
                const((action_dim, embed_dim)),                    # w_var
                const((1, embed_dim)),                             # summed input bias
                const((embed_dim, slot_dim)),                      # head weight (LN-gamma folded)
                const((1, slot_dim)),                              # head bias (LN-beta folded)
            ],
            out_specs=pl.BlockSpec((tm, slot_dim), lambda i: (i, 0)),
        ),
        compiler_params=pltpu.CompilerParams(
            dimension_semantics=("parallel",),
            vmem_limit_bytes=vmem_limit,
        ),
        cost_estimate=cost,
    )(s2, p2, v2, w_tok, w_act, w_var, b_in, w_head, b_head)

    return out2.reshape(B, N, slot_dim)


# -----------------------------------------------------------------------------
# Pure-JAX reference (mirrors the PyTorch semantics)
# -----------------------------------------------------------------------------
def reference_forward(slots, action_protos, action_vars, params,
                      *, residual=True, eps=1e-5):
    tokens = slots @ params["w_tok"] + params["b_tok"]
    cond = tokens + (action_protos @ params["w_act"] + params["b_act"])
    cond = cond + (action_vars @ params["w_var"] + params["b_var"])
    mean = jnp.mean(cond, axis=-1, keepdims=True)
    var = jnp.mean((cond - mean) ** 2, axis=-1, keepdims=True)
    normed = (cond - mean) / jnp.sqrt(var + eps)
    normed = normed * params["ln_gamma"] + params["ln_beta"]
    out = normed @ params["w_head"] + params["b_head"]
    if residual:
        out = out + slots
    return out


# -----------------------------------------------------------------------------
# Deterministic parameter init (synthetic; matches nn.Module shapes)
# -----------------------------------------------------------------------------
def init_params(key, slot_dim, embed_dim, action_dim, dtype=jnp.float32):
    ks = jax.random.split(key, 4)

    def lin(k, fan_in, fan_out):
        scale = 1.0 / jnp.sqrt(fan_in)
        kw, kb = jax.random.split(k)
        w = jax.random.uniform(kw, (fan_in, fan_out), dtype, -scale, scale)
        b = jax.random.uniform(kb, (1, fan_out), dtype, -scale, scale)
        return w, b

    w_tok, b_tok = lin(ks[0], slot_dim, embed_dim)      # tok_emb
    w_act, b_act = lin(ks[1], action_dim, embed_dim)    # action_emb
    w_var, b_var = lin(ks[2], action_dim, embed_dim)    # variability_emb
    w_head, b_head = lin(ks[3], embed_dim, slot_dim)    # regression_head[1]
    # nn.LayerNorm default affine: weight=1, bias=0
    ln_gamma = jnp.ones((1, embed_dim), dtype)
    ln_beta = jnp.zeros((1, embed_dim), dtype)
    return dict(w_tok=w_tok, b_tok=b_tok, w_act=w_act, b_act=b_act,
                w_var=w_var, b_var=b_var, ln_gamma=ln_gamma, ln_beta=ln_beta,
                w_head=w_head, b_head=b_head)


if __name__ == "__main__":
    # Small shapes consistent with the module defaults
    B, N = 2, 8                 # batch, number of object slots
    slot_dim, embed_dim, action_dim = 64, 128, 32

    key = jax.random.PRNGKey(0)
    k_s, k_a, k_v, k_p, k_g, k_b = jax.random.split(key, 6)

    slots = jax.random.normal(k_s, (B, N, slot_dim), jnp.float32)
    action_protos = jax.random.normal(k_a, (B, N, action_dim), jnp.float32)
    action_vars = jax.random.normal(k_v, (B, N, action_dim), jnp.float32)
    params = init_params(k_p, slot_dim, embed_dim, action_dim)
    # Perturb LN affine away from the (1, 0) default so the wrapper-side
    # gamma/beta -> head fold is actually exercised by the check.
    params["ln_gamma"] = params["ln_gamma"] + 0.1 * jax.random.normal(k_g, (1, embed_dim))
    params["ln_beta"] = params["ln_beta"] + 0.1 * jax.random.normal(k_b, (1, embed_dim))

    ref = reference_forward(slots, action_protos, action_vars, params, residual=True)

    # Exact-semantics path (f32 matmuls): tight check against the module reference.
    out_f32 = slot_dynamics_forward(slots, action_protos, action_vars, params,
                                    residual=True, compute_dtype=jnp.float32)
    out_f32 = jax.block_until_ready(out_f32)
    assert out_f32.shape == (B, N, slot_dim)
    assert jnp.allclose(out_f32, ref, atol=1e-4, rtol=1e-4), "f32 kernel mismatch vs reference"

    # Fast path (default: bf16 MXU operands, f32 LayerNorm + f32 residual from slots).
    out_bf16 = slot_dynamics_forward(slots, action_protos, action_vars, params,
                                     residual=True)
    out_bf16 = jax.block_until_ready(out_bf16)
    assert out_bf16.shape == (B, N, slot_dim)
    assert jnp.allclose(out_bf16, ref, atol=3e-2, rtol=3e-2), "bf16 kernel mismatch vs reference"

    print("KERNEL_OK")
</pallas_src>

<mosaic_0001>
module attributes {stable_mosaic.version = 11 : i64} {
  func.func @_dynamics_kernel(%arg0: i32, %arg1: memref<8x64xf32, #tpu.memory_space<vmem>>, %arg2: memref<8x32xf32, #tpu.memory_space<vmem>>, %arg3: memref<8x32xf32, #tpu.memory_space<vmem>>, %arg4: memref<64x128xf32, #tpu.memory_space<vmem>>, %arg5: memref<32x128xf32, #tpu.memory_space<vmem>>, %arg6: memref<32x128xf32, #tpu.memory_space<vmem>>, %arg7: memref<1x128xf32, #tpu.memory_space<vmem>>, %arg8: memref<128x64xf32, #tpu.memory_space<vmem>>, %arg9: memref<1x64xf32, #tpu.memory_space<vmem>>, %arg10: memref<8x64xf32, #tpu.memory_space<vmem>>) attributes {dimension_semantics = [#tpu.dimension_semantics<parallel>], iteration_bounds = array<i64: 2>, scalar_prefetch = 0 : i64, scratch_operands = 0 : i64, tpu.core_type = #tpu.core_type<tc>, window_params = [{transform_indices = @transform_0, window_bounds = array<i64: 8, 64>}, {transform_indices = @transform_1, window_bounds = array<i64: 8, 32>}, {transform_indices = @transform_2, window_bounds = array<i64: 8, 32>}, {pipeline_mode = #tpu.pipeline_mode<synchronous>, transform_indices = @transform_3, window_bounds = array<i64: 64, 128>}, {pipeline_mode = #tpu.pipeline_mode<synchronous>, transform_indices = @transform_4, window_bounds = array<i64: 32, 128>}, {pipeline_mode = #tpu.pipeline_mode<synchronous>, transform_indices = @transform_5, window_bounds = array<i64: 32, 128>}, {pipeline_mode = #tpu.pipeline_mode<synchronous>, transform_indices = @transform_6, window_bounds = array<i64: 1, 128>}, {pipeline_mode = #tpu.pipeline_mode<synchronous>, transform_indices = @transform_7, window_bounds = array<i64: 128, 64>}, {pipeline_mode = #tpu.pipeline_mode<synchronous>, transform_indices = @transform_8, window_bounds = array<i64: 1, 64>}, {transform_indices = @transform_9, window_bounds = array<i64: 8, 64>}]} {
    %c0 = arith.constant 0 : index
    %c0_0 = arith.constant 0 : index
    %0 = vector.load %arg1[%c0, %c0_0] : memref<8x64xf32, #tpu.memory_space<vmem>>, vector<8x64xf32>
    %c0_1 = arith.constant 0 : index
    %c0_2 = arith.constant 0 : index
    %1 = vector.load %arg4[%c0_1, %c0_2] : memref<64x128xf32, #tpu.memory_space<vmem>>, vector<64x128xf32>
    %cst = arith.constant dense<0.000000e+00> : vector<8x128xf32>
    %2 = tpu.matmul %0, %1, %cst {dimension_numbers = #tpu.dot_dimension_numbers<[1], [0], [0], [1], [0, 0, 1, 1], [], []>} : vector<8x64xf32>, vector<64x128xf32>, vector<8x128xf32> -> vector<8x128xf32>
    %c0_3 = arith.constant 0 : index
    %c0_4 = arith.constant 0 : index
    %3 = vector.load %arg2[%c0_3, %c0_4] : memref<8x32xf32, #tpu.memory_space<vmem>>, vector<8x32xf32>
    %c0_5 = arith.constant 0 : index
    %c0_6 = arith.constant 0 : index
    %4 = vector.load %arg5[%c0_5, %c0_6] : memref<32x128xf32, #tpu.memory_space<vmem>>, vector<32x128xf32>
    %cst_7 = arith.constant dense<0.000000e+00> : vector<8x128xf32>
    %5 = tpu.matmul %3, %4, %cst_7 {dimension_numbers = #tpu.dot_dimension_numbers<[1], [0], [0], [1], [0, 0, 1, 1], [], []>} : vector<8x32xf32>, vector<32x128xf32>, vector<8x128xf32> -> vector<8x128xf32>
    %6 = arith.addf %2, %5 : vector<8x128xf32>
    %c0_8 = arith.constant 0 : index
    %c0_9 = arith.constant 0 : index
    %7 = vector.load %arg3[%c0_8, %c0_9] : memref<8x32xf32, #tpu.memory_space<vmem>>, vector<8x32xf32>
    %c0_10 = arith.constant 0 : index
    %c0_11 = arith.constant 0 : index
    %8 = vector.load %arg6[%c0_10, %c0_11] : memref<32x128xf32, #tpu.memory_space<vmem>>, vector<32x128xf32>
    %cst_12 = arith.constant dense<0.000000e+00> : vector<8x128xf32>
    %9 = tpu.matmul %7, %8, %cst_12 {dimension_numbers = #tpu.dot_dimension_numbers<[1], [0], [0], [1], [0, 0, 1, 1], [], []>} : vector<8x32xf32>, vector<32x128xf32>, vector<8x128xf32> -> vector<8x128xf32>
    %10 = arith.addf %6, %9 : vector<8x128xf32>
    %c0_13 = arith.constant 0 : index
    %c0_14 = arith.constant 0 : index
    %11 = vector.load %arg7[%c0_13, %c0_14] : memref<1x128xf32, #tpu.memory_space<vmem>>, vector<1x128xf32>
    %12 = vector.broadcast %11 : vector<1x128xf32> to vector<8x128xf32>
    %13 = arith.addf %10, %12 : vector<8x128xf32>
    %cst_15 = arith.constant dense<0.000000e+00> : vector<8xf32>
    %14 = vector.multi_reduction <add>, %13, %cst_15 [1] : vector<8x128xf32> to vector<8xf32>
    %15 = vector.shape_cast %14 : vector<8xf32> to vector<8x1xf32>
    %cst_16 = arith.constant 1.280000e+02 : f32
    %16 = vector.broadcast %cst_16 : f32 to vector<8x1xf32>
    %17 = arith.divf %15, %16 : vector<8x1xf32>
    %18 = vector.broadcast %17 : vector<8x1xf32> to vector<8x128xf32>
    %19 = arith.subf %13, %18 : vector<8x128xf32>
    %20 = arith.mulf %19, %19 : vector<8x128xf32>
    %cst_17 = arith.constant dense<0.000000e+00> : vector<8xf32>
    %21 = vector.multi_reduction <add>, %20, %cst_17 [1] : vector<8x128xf32> to vector<8xf32>
    %22 = vector.shape_cast %21 : vector<8xf32> to vector<8x1xf32>
    %cst_18 = arith.constant 1.280000e+02 : f32
    %23 = vector.broadcast %cst_18 : f32 to vector<8x1xf32>
    %24 = arith.divf %22, %23 : vector<8x1xf32>
    %cst_19 = arith.constant 9.99999974E-6 : f32
    %25 = vector.broadcast %cst_19 : f32 to vector<8x1xf32>
    %26 = arith.addf %24, %25 : vector<8x1xf32>
    %27 = math.rsqrt %26 : vector<8x1xf32>
    %28 = vector.broadcast %27 : vector<8x1xf32> to vector<8x128xf32>
    %29 = arith.mulf %19, %28 : vector<8x128xf32>
    %c0_20 = arith.constant 0 : index
    %c0_21 = arith.constant 0 : index
    %30 = vector.load %arg8[%c0_20, %c0_21] : memref<128x64xf32, #tpu.memory_space<vmem>>, vector<128x64xf32>
    %cst_22 = arith.constant dense<0.000000e+00> : vector<8x64xf32>
    %31 = tpu.matmul %29, %30, %cst_22 {dimension_numbers = #tpu.dot_dimension_numbers<[1], [0], [0], [1], [0, 0, 1, 1], [], []>} : vector<8x128xf32>, vector<128x64xf32>, vector<8x64xf32> -> vector<8x64xf32>
    %c0_23 = arith.constant 0 : index
    %c0_24 = arith.constant 0 : index
    %32 = vector.load %arg9[%c0_23, %c0_24] : memref<1x64xf32, #tpu.memory_space<vmem>>, vector<1x64xf32>
    %33 = vector.broadcast %32 : vector<1x64xf32> to vector<8x64xf32>
    %34 = arith.addf %31, %33 : vector<8x64xf32>
    %35 = arith.addf %34, %0 : vector<8x64xf32>
    %c0_25 = arith.constant 0 : index
    %c0_26 = arith.constant 0 : index
    %36 = vector.load %arg10[%c0_25, %c0_26] : memref<8x64xf32, #tpu.memory_space<vmem>>, vector<8x64xf32>
    tpu.vector_store %arg10[%c0_25, %c0_26], %35 {strides = array<i32>} : memref<8x64xf32, #tpu.memory_space<vmem>>, vector<8x64xf32>,
    return
  }
  func.func @transform_0(%arg0: i32) -> (i32, i32) {
    %c0_i32 = arith.constant 0 : i32
    %c0_i32_0 = arith.constant 0 : i32
    return %arg0, %c0_i32 : i32, i32
  }
  func.func @transform_1(%arg0: i32) -> (i32, i32) {
    %c0_i32 = arith.constant 0 : i32
    %c0_i32_0 = arith.constant 0 : i32
    return %arg0, %c0_i32 : i32, i32
  }
  func.func @transform_2(%arg0: i32) -> (i32, i32) {
    %c0_i32 = arith.constant 0 : i32
    %c0_i32_0 = arith.constant 0 : i32
    return %arg0, %c0_i32 : i32, i32
  }
  func.func @transform_3(%arg0: i32) -> (i32, i32) {
    %c0_i32 = arith.constant 0 : i32
    %c0_i32_0 = arith.constant 0 : i32
    %c0_i32_1 = arith.constant 0 : i32
    return %c0_i32, %c0_i32_0 : i32, i32
  }
  func.func @transform_4(%arg0: i32) -> (i32, i32) {
    %c0_i32 = arith.constant 0 : i32
    %c0_i32_0 = arith.constant 0 : i32
    %c0_i32_1 = arith.constant 0 : i32
    return %c0_i32, %c0_i32_0 : i32, i32
  }
  func.func @transform_5(%arg0: i32) -> (i32, i32) {
    %c0_i32 = arith.constant 0 : i32
    %c0_i32_0 = arith.constant 0 : i32
    %c0_i32_1 = arith.constant 0 : i32
    return %c0_i32, %c0_i32_0 : i32, i32
  }
  func.func @transform_6(%arg0: i32) -> (i32, i32) {
    %c0_i32 = arith.constant 0 : i32
    %c0_i32_0 = arith.constant 0 : i32
    %c0_i32_1 = arith.constant 0 : i32
    return %c0_i32, %c0_i32_0 : i32, i32
  }
  func.func @transform_7(%arg0: i32) -> (i32, i32) {
    %c0_i32 = arith.constant 0 : i32
    %c0_i32_0 = arith.constant 0 : i32
    %c0_i32_1 = arith.constant 0 : i32
    return %c0_i32, %c0_i32_0 : i32, i32
  }
  func.func @transform_8(%arg0: i32) -> (i32, i32) {
    %c0_i32 = arith.constant 0 : i32
    %c0_i32_0 = arith.constant 0 : i32
    %c0_i32_1 = arith.constant 0 : i32
    return %c0_i32, %c0_i32_0 : i32, i32
  }
  func.func @transform_9(%arg0: i32) -> (i32, i32) {
    %c0_i32 = arith.constant 0 : i32
    %c0_i32_0 = arith.constant 0 : i32
    return %arg0, %c0_i32 : i32, i32
  }
}

</mosaic_0001>

<bundles_post_ra>
// kernel: tpu_custom_call.1
= control target key start
LH: loop header
LB: loop body
LE: loop exit
PB: predicated region body
PF: predicated region fallthrough
CT: control target
= control target key end

     0   :  { %14 = vsyncpa [#allocation3], 0  ;;  %s1350_s0 = inlined_call_operand.vmem [shape: f32[16,64], index: 0, kind: input, shape index: {}]   ;;  %s1351_s1 = inlined_call_operand.vmem [shape: f32[16,32], index: 1, kind: input, shape index: {}]   ;;  %s1352_s2 = inlined_call_operand.vmem [shape: f32[16,32], index: 2, kind: input, shape index: {}]   ;;  %s1353_s3 = inlined_call_operand.vmem [shape: f32[64,128], index: 3, kind: input, shape index: {}]   ;;  %s1354_s4 = inlined_call_operand.vmem [shape: f32[32,128], index: 4, kind: input, shape index: {}]   ;;  %s1355_s5 = inlined_call_operand.vmem [shape: f32[32,128], index: 5, kind: input, shape index: {}]   ;;  %s1356_s6 = inlined_call_operand.vmem [shape: f32[1,128], index: 6, kind: input, shape index: {}]   ;;  %s1357_s7 = inlined_call_operand.vmem [shape: f32[128,64], index: 7, kind: input, shape index: {}]   ;;  %s1358_s8 = inlined_call_operand.vmem [shape: f32[1,64], index: 8, kind: input, shape index: {}]   ;;  %s1359_s9 = inlined_call_operand.hbm [shape: f32[16,64], index: 9, kind: output, shape index: {}]  }
   0x1   :  { %16 = vsyncpa [#allocation3 + $0x1], 0  ;;  %s1102_s30 = smov 0   ;;  %s1104_s10 = smov 0  }
   0x2   :  { %s1106_s11 = smov 0   ;;  %s1108_s12 = smov 0  }
   0x3 LB: > { %s1123_s13 = sadd.s32 4294967295, %s1047_s12   ;;  %s815_s14 = sadd.s32 4294967294, %s1047_s12   ;;  %s1047_s12 = sphi %s1108_s12, %s1365_s12   ;;  %s1043_s11 = sphi %s1106_s11, %s1364_s11   ;;  %s1039_s10 = sphi %s1104_s10, %s1363_s10   ;;  %s1035_s30 = sphi %s1102_s30, %s1362_s30  }
   0x4   : > { %s1127_s15 = sadd.s32 1, %s1047_s12   ;;  %s233_s16 = sadd.s32 1, %s1043_s11 }
   0x5   : > { %s230_s17 = ssub.s32 %s1047_s12, %s1127_s15  ;;  %p243_p0 = scmp.ne.s32.totalorder %s1043_s11, %s1039_s10 }
   0x6   : > { %p231_p1 = scmp.eq.s32.totalorder %s230_s17, 0  ;;  %p244_p2 = scmp.eq.s32.totalorder %s1123_s13, 1 }
   0x7   : > { %p249_p3 = scmp.ne.s32.totalorder %s1039_s10, %s1035_s30  ;;  %p250_p4 = scmp.eq.s32.totalorder %s815_s14, 1 }
   0x8   : > { %s1138_s18 = scalar_select %p231_p1, %s1043_s11, %s233_s16  }
   0x9   : > { %p1140_p5 = por %p244_p2, %p243_p0  ;;  %p1144_p6 = por %p250_p4, %p249_p3 }
   0xa   : > { %p818_p7 = scmp.ge.s32.totalorder %s1047_s12, 1  ;;  %p307_p8 = scmp.lt.s32.totalorder %s1047_s12, 3 }
   0xc   : > { %p308_p9 = pnand %p818_p7, %p307_p8 }
   0xd   : > { %p350_p10 = scmp.lt.s32.totalorder (!%p308_p9), %s1123_s13, 1  ;;  %s347_s29 = sand.u32 (!%p308_p9), 1, %s1039_s10  }
   0xe   : > { %311 = sbr.rel (%p308_p9) target bundleno = 761 (0x2f9), region = 56  ;;  %s819_s14 = sshll.u32 (!%p308_p9), %s347_s29, 3 }
   0xf   : > { %s829_s17 = sshll.u32 (!%p308_p9), %s1123_s13, 7  ;;  %s719_s26 = scalar_lea.sflag (!%p308_p9), [#allocation3], %s347_s29 }
  0x13   : > { %v375_v0 = vld [vmem:[%s1354_s4 + $0x18] sm:$0xff]  ;;  %v1049_v1 = vmov 0.0   ;;  %v374_v2 = vld [vmem:[%s1354_s4 + $0x10] sm:$0xff]  ;;  %vm1050_vm0 = vmmov 0   ;;  %s351_s25 = scalar_select %p350_p10, %s1123_s13, 1  ;;  %v373_v3 = vld [vmem:[%s1354_s4 + $0x8] sm:$0xff] }
  0x14   : > { %868 = vmatprep.subr.mxu1 %v1049_v1  ;;  %876 = vmatprep.mubr.msk.f32.mxu1 %vm1050_vm0, %v1049_v1  ;;  %v372_v4 = vld [vmem:[%s1354_s4] sm:$0xff]  ;;  %vm376_vm1 = vcmask 261120   ;;  %v370_v6 = vld [vmem:[%s1353_s3 + $0x38] sm:$0xff]  ;;  %v369_v7 = vld [vmem:[%s1353_s3 + $0x30] sm:$0xff]  ;;  %vm450_vm2 = vcmask 523264   ;;  %s1051_s13 = smov [#allocation2]  }
  0x15   : > { %869 = vmatpush3.msra.mxu1 %v375_v0  ;;  %909 = vmatprep.subr.mxu0 %v1049_v1  ;;  %s1168_s28 = sshll.u32 %s351_s25, 3  ;;  %v368_v8 = vld [vmem:[%s1353_s3 + $0x28] sm:$0xff]  ;;  %v367_v9 = vld [vmem:[%s1353_s3 + $0x20] sm:$0xff]  ;;  %v366_v10 = vld [vmem:[%s1353_s3 + $0x18] sm:$0xff]  ;;  %s730_s25 = scalar_lea.hbm %s1359_s9, %s829_s17 }
  0x16   : > { %870 = vmatprep.subr.mxu1 %v1049_v1  ;;  %941 = vmatprep.mubr.msk.f32.mxu0 %vm1050_vm0, %v1049_v1  ;;  %s357_s21 = scalar_lea.vmem %s1351_s1, %s1168_s28  ;;  %v365_v11 = vld [vmem:[%s1353_s3 + $0x10] sm:$0xff]  ;;  %v364_v12 = vld [vmem:[%s1353_s3 + $0x8] sm:$0xff]  ;;  %s353_s27 = scalar_lea.vmem %s1350_s0, %s1168_s28  ;;  %v363_v13 = vld [vmem:[%s1353_s3] sm:$0xff] }
  0x17   : > { %871 = vmatpush3.msra.mxu1 %v374_v2  ;;  %v371_v5 = vld [vmem:[%s357_s21] sm:$0xff]  ;;  %v528_v15 = vld [vmem:[%s1355_s5 + $0x18] sm:$0xff]  ;;  %v527_v16 = vld [vmem:[%s1355_s5 + $0x10] sm:$0xff]  ;;  %s349_s21 = scalar_lea.vmem [#allocation2], %s819_s14  ;;  %s991_s14 = sshll.u32 %s1051_s13, 4  ;;  %s992_s14 = int_to_ptr.vmem [resolvable:$false] %s991_s14 }
  0x18   : > { %872 = vmatprep.subr.mxu1 %v1049_v1  ;;  %v1217_v14 = vld [vmem:[%s353_s27] sm:$0xff]  ;;  %v526_v17 = vld [vmem:[%s1355_s5 + $0x8] sm:$0xff]  ;;  %s361_s27 = scalar_lea.vmem %s1352_s2, %s1168_s28  ;;  %v638_v30 = vld [vmem:[%s1357_s7 + $0x78] sm:$0xff]  ;;  %s732_s22 = sshll.u32 %s349_s21, 4  ;;  %s733_s22 = int_to_ptr.vmem [resolvable:$true] %s732_s22 }
  0x19   : > { %873 = vmatpush3.msra.mxu1 %v373_v3  ;;  %v525_v18 = vld [vmem:[%s1355_s5] sm:$0xff]  ;;  %v637_v31 = vld [vmem:[%s1357_s7 + $0x70] sm:$0xff]  ;;  %910 = vmatpush3.msra.mxu0 %v638_v30  ;;  %v636_v32 = vld [vmem:[%s1357_s7 + $0x68] sm:$0xff]  ;;  %s993_s28 = scalar_lea.vmem %s992_s14, 256  ;;  %p994_p0 = scmp.lt.s32.totalorder %s733_s22, %s992_s14 }
  0x1a   : > { %874 = vmatprep.subr.mxu1 %v1049_v1  ;;  %v524_v19 = vld [vmem:[%s361_s27] sm:$0xff]  ;;  %911 = vmatprep.subr.mxu0 %v1049_v1  ;;  %v634_v34 = vld [vmem:[%s1357_s7 + $0x58] sm:$0xff]  ;;  %v633_v35 = vld [vmem:[%s1357_s7 + $0x50] sm:$0xff]  ;;  %s987_s27 = scalar_lea.vmem %s733_s22, 128 }
  0x1b   : > { %875 = vmatpush3.msra.mxu1 %v372_v4  ;;  %v826_v26 = vld [vmem:[%s1356_s6] ss:$0 sm:$0xff]  ;;  %912 = vmatpush3.msra.mxu0 %v637_v31  ;;  %v632_v40 = vld [vmem:[%s1357_s7 + $0x48] sm:$0xff]  ;;  %v630_v42 = vld [vmem:[%s1357_s7 + $0x38] sm:$0xff]  ;;  %p988_p11 = scmp.ne.s32.totalorder %s733_s22, %s987_s27  ;;  %p995_p1 = scmp.lt.s32.totalorder %s993_s28, %s987_s27 }
  0x1c   : > { %877 = vmatmul.mubr.msk.f32.vlgmr.msra.gmra.mxu1 %vm376_vm1, %v371_v5  ;;  %879 = vmatprep.subr.mxu1 %v1049_v1  ;;  %v635_v33 = vld [vmem:[%s1357_s7 + $0x60] sm:$0xff]  ;;  %v629_v43 = vld [vmem:[%s1357_s7 + $0x30] sm:$0xff]  ;;  %v628_v44 = vld [vmem:[%s1357_s7 + $0x28] sm:$0xff] }
  0x1d   : > { %880 = vmatpush3.msra.mxu1 %v370_v6  ;;  %895 = vmatprep.mubr.msk.f32.mxu1 %vm1050_vm0, %v1049_v1  ;;  %v631_v41 = vld [vmem:[%s1357_s7 + $0x40] sm:$0xff]  ;;  %v626_v46 = vld [vmem:[%s1357_s7 + $0x18] sm:$0xff]  ;;  %v625_v47 = vld [vmem:[%s1357_s7 + $0x10] sm:$0xff]  ;;  %p989_p12 = pnand %p988_p11, %p1140_p5  ;;  %p996_p2 = por %p995_p1, %p994_p0 }
  0x1e   : > { %881 = vmatprep.subr.mxu1 %v1049_v1  ;;  %913 = vmatprep.subr.mxu0 %v1049_v1  ;;  %v627_v45 = vld [vmem:[%s1357_s7 + $0x20] sm:$0xff]  ;;  %v624_v48 = vld [vmem:[%s1357_s7 + $0x8] sm:$0xff] }
  0x1f   : > { %882 = vmatpush3.msra.mxu1 %v369_v7  ;;  %914 = vmatpush3.msra.mxu0 %v636_v32  ;;  %v623_v49 = vld [vmem:[%s1357_s7] sm:$0xff]  ;;  %p990_p13 = pneg %p989_p12 }
  0x20   : > { %883 = vmatprep.subr.mxu1 %v1049_v1  ;;  %915 = vmatprep.subr.mxu0 %v1049_v1  ;;  %v827_v55 = vld [vmem:[%s1358_s8] ss:$0 sm:$0xff] }
  0x21   : > { %884 = vmatpush3.msra.mxu1 %v368_v8  ;;  %916 = vmatpush3.msra.mxu0 %v635_v33  ;;  %p997_p3 = pnand %p996_p2, %p990_p13 }
  0x22   : > { %885 = vmatprep.subr.mxu1 %v1049_v1  ;;  %917 = vmatprep.subr.mxu0 %v1049_v1 }
  0x23   : > { %886 = vmatpush3.msra.mxu1 %v367_v9  ;;  %918 = vmatpush3.msra.mxu0 %v634_v34 }
  0x24   : > { %887 = vmatprep.subr.mxu1 %v1049_v1  ;;  %919 = vmatprep.subr.mxu0 %v1049_v1 }
  0x25   : > { %888 = vmatpush3.msra.mxu1 %v366_v10  ;;  %920 = vmatpush3.msra.mxu0 %v633_v35 }
  0x26   : > { %889 = vmatprep.subr.mxu1 %v1049_v1  ;;  %921 = vmatprep.subr.mxu0 %v1049_v1 }
  0x27   : > { %890 = vmatpush3.msra.mxu1 %v365_v11  ;;  %922 = vmatpush3.msra.mxu0 %v632_v40 }
  0x28   : > { %891 = vmatprep.subr.mxu1 %v1049_v1  ;;  %923 = vmatprep.subr.mxu0 %v1049_v1 }
  0x29   : > { %892 = vmatpush3.msra.mxu1 %v364_v12  ;;  %924 = vmatpush3.msra.mxu0 %v631_v41 }
  0x2a   : > { %893 = vmatprep.subr.mxu1 %v1049_v1  ;;  %925 = vmatprep.subr.mxu0 %v1049_v1 }
  0x2b   : > { %894 = vmatpush3.msra.mxu1 %v363_v13  ;;  %926 = vmatpush3.msra.mxu0 %v630_v42 }
  0x2c   : > { %896 = vmatmul.mubr.msk.f32.vlgmr.msra.gmra.mxu1 %vm450_vm2, %v1217_v14  ;;  %898 = vmatprep.subr.mxu1 %v1049_v1 }
  0x2d   : > { %899 = vmatpush3.msra.mxu1 %v528_v15  ;;  %906 = vmatprep.mubr.msk.f32.mxu1 %vm1050_vm0, %v1049_v1 }
  0x2e   : > { %900 = vmatprep.subr.mxu1 %v1049_v1  ;;  %927 = vmatprep.subr.mxu0 %v1049_v1 }
  0x2f   : > { %901 = vmatpush3.msra.mxu1 %v527_v16  ;;  %928 = vmatpush3.msra.mxu0 %v629_v43 }
  0x30   : > { %902 = vmatprep.subr.mxu1 %v1049_v1  ;;  %929 = vmatprep.subr.mxu0 %v1049_v1 }
  0x31   : > { %903 = vmatpush3.msra.mxu1 %v526_v17  ;;  %930 = vmatpush3.msra.mxu0 %v628_v44 }
  0x32   : > { %904 = vmatprep.subr.mxu1 %v1049_v1  ;;  %931 = vmatprep.subr.mxu0 %v1049_v1 }
  0x33   : > { %905 = vmatpush3.msra.mxu1 %v525_v18  ;;  %932 = vmatpush3.msra.mxu0 %v627_v45 }
  0x34   : > { %907 = vmatmul.mubr.msk.f32.vlgmr.msra.gmra.mxu1 %vm376_vm1, %v524_v19  ;;  %933 = vmatprep.subr.mxu0 %v1049_v1 }
  0x35   : > { %934 = vmatpush3.msra.mxu0 %v626_v46 }
  0x36   : > { %935 = vmatprep.subr.mxu0 %v1049_v1 }
  0x37   : > { %936 = vmatpush3.msra.mxu0 %v625_v47 }
  0x38   : > { %937 = vmatprep.subr.mxu0 %v1049_v1 }
  0x39   : > { %938 = vmatpush3.msra.mxu0 %v624_v48 }
  0x3a   : > { %939 = vmatprep.subr.mxu0 %v1049_v1 }
  0x3b   : > { %940 = vmatpush3.msra.mxu0 %v623_v49 }
  0xdc   : > { %v446_v20 = vpop.f32.mrf.mxu1 }
  0xde   : > { %v878_v21 = vpop.f32.mrf.mxu1 }
  0xec   : > { %v520_v22 = vpop.f32.mrf.mxu1 }
  0xed   : > { %v521_v24 = vadd.f32 %v520_v22, %v446_v20 }
  0xee   : > { %v897_v23 = vpop.f32.mrf.mxu1 }
  0xf4   : > { %v598_v25 = vpop.f32.mrf.mxu1 }
  0xf5   : > { %v602_v27 = vadd.f32 %v598_v25, %v521_v24 }
  0xf6   : > { %v908_v28 = vpop.f32.mrf.mxu1 }
  0xf7   : > { %v610_v29 = vadd.f32 %v826_v26, %v602_v27 }
  0xf9   : > { %611 = vadd.xlane.f32.xlu0 %v610_v29 }
 0x182   : > { %v612_v36 = vpop.xlane.xlu0 %611 }
 0x183   : > { %v614_v37 = vmul.f32 0.0078125, %v612_v36 }
 0x185   : > { %v615_v38 = vsub.f32 %v610_v29, %v614_v37 }
 0x187   : > { %v616_v39 = vmul.f32 %v615_v38, %v615_v38 }
 0x189   : > { %617 = vadd.xlane.f32.xlu0 %v616_v39 }
 0x212   : > { %v618_v50 = vpop.xlane.xlu0 %617 }
 0x213   : > { %v619_v51 = vmul.f32 0.0078125, %v618_v50 }
 0x215   : > { %v620_v52 = vadd.f32 1e-05, %v619_v51 }
 0x217   : > { %985 = vrsqrt.f32 %v620_v52 }
 0x224   : > { %v986_v53 = vpop.eup %985 }
 0x225   : > { %v622_v54 = vmul.f32 %v986_v53, %v615_v38 }
 0x227   : > { %942 = vmatmul.mubr.f32.vlgmr.msra.gmra.mxu0 %v622_v54 }
 0x2e7   : > { %v712_v56 = vpop.f32.mrf.mxu0 }
 0x2e8   : > { %v713_v57 = vadd.f32 %v827_v55, %v712_v56 }
 0x2e9   : > { %v943_v58 = vpop.f32.mrf.mxu0 }
 0x2ea   : > { %v716_v59 = vadd.f32 %v713_v57, %v1217_v14 }
 0x2ec   : > { %717 = vst.msk [vmem:[%s349_s21] sm:$0xff] %vm450_vm2, %v716_v59 }
 0x2ed   : > { %1000 = shalt.err (!%p997_p3)
}
 0x2ee   : > { %s1001_s16 = scalar_lea.hbm %s730_s25, 128  ;;  %s1005_s21 = scalar_lea.hbm %s1359_s9, 256 }
 0x2ef   : > { %p1002_p4 = scmp.ne.s32.totalorder %s730_s25, %s1001_s16  ;;  %p1006_p9 = scmp.lt.s32.totalorder %s730_s25, %s1359_s9 }
 0x2f0   : > { %p1007_p10 = scmp.lt.s32.totalorder %s1005_s21, %s1001_s16 }
 0x2f1   : > { %p1003_p7 = pnand %p1002_p4, %p1140_p5 }
 0x2f2   : > { %p1008_p11 = por %p1007_p10, %p1006_p9 }
 0x2f3   : > { %p1004_p8 = pneg %p1003_p7 }
 0x2f5   : > { %p1009_p12 = pnand %p1008_p11, %p1004_p8 }
 0x2f7   : > { %1012 = shalt.err (!%p1009_p12)
}
 0x2f8   : > { %944 = dma.vmem_to_hbm [thread:$0]  (%p1140_p5), %s733_s22, 128, %s730_s25, %s719_s26  }
 0x2f9 PF: > { %p950_p13 = scmp.ge.s32.totalorder %s1047_s12, 2  ;;  %s744_s27 = sand.u32 1, %s1035_s30  }
 0x2fa   : > { %s745_s13 = scalar_lea.sflag [#allocation3], %s744_s27 }
 0x2fb   : > { %p947_p0 = pnand %p950_p13, %p1144_p6 }
 0x2fd   : > { %p948_p1 = pneg %p947_p0 }
 0x2ff   : > { %1030 = dma.done.wait (%p948_p1), %s745_s13, 128  }
 0x300   : > { %1032 = vsyncadd (%p948_p1), %s745_s13, 4294967168  ;;  %p19_p2 = scmp.ge.s32.totalorder %s1127_s15, 4   ;;  %s1362_s30 = smov %s1039_s10 }
 0x301   : > { %s1363_s10 = smov %s1043_s11  ;;  %s1364_s11 = smov %s1138_s18 }
 0x302   : > { %s1365_s12 = smov %s1127_s15  ;;  %21 = sbr.rel (!%p19_p2) target bundleno = 3 (0x3), region = 97 }
 0x307   :  { %750 = vsyncpa [#allocation3], 1 }
 0x308   :  { %752 = vsyncpa [#allocation3 + $0x1], 1 }

</bundles_post_ra>
